<compile_context>
chip_gen: v6e
topology: v6e:2x2x1
jax: 0.10.0
libtpu: 0.0.40
codegen_flags: <defaults>
</compile_context>

<pallas_src>
import jax
import jax.numpy as jnp
from jax.experimental import pallas as pl
from jax.experimental.pallas import tpu as pltpu


def _critic_kernel(x_ref, w1_ref, b1_ref, w2_ref, b2_ref, out_ref):
    # x:  [TB, d_in]            w1: [d_in, 128]   b1: [1, 128]
    # w2: [1, 128] (row)        b2: (1, 1) scalar in SMEM
    # out: [1, TB]  (lane-dense row per grid step)
    h = jnp.dot(x_ref[...], w1_ref[...], preferred_element_type=jnp.float32)
    h = jnp.maximum(h + b1_ref[...], 0.0)  # bias + ReLU on the VPU
    # Second layer (128 -> 1): VPU multiply + lane reduce (no N=1 MXU pass).
    # Dropping keepdims yields a lane-major (TB,) result, so the store below is
    # a full-width unmasked vst instead of TB/8 masked single-lane stores.
    y = jnp.sum(h * w2_ref[...], axis=-1) + b2_ref[0, 0]
    out_ref[...] = y.reshape(1, -1).astype(out_ref.dtype)


def _default_tile_b_max():
    """Generation-aware batch-tile cap (rows per grid step)."""
    try:
        kind = jax.devices()[0].device_kind.lower()
    except Exception:
        return 8192
    if "v6" in kind:
        return 16384  # 32 MiB default scoped VMEM, ~1.3-1.4 TB/s HBM
    # v5e (16 MiB default scoped VMEM) and v7x (64 MiB physical, 2 TCs that we
    # want >= 2 grid steps for) both prefer the smaller tile.
    return 8192


def _choose_tile(batch, tile_b_max):
    """Pick a batch tile (multiple of 128) and padded batch size."""
    b128 = pl.cdiv(batch, 128) * 128
    if b128 <= tile_b_max:
        if b128 >= 2048:
            # Big enough batch: use >= 2 tiles so the "parallel" axis can
            # shard across both v7x TensorCores (harmless on v5e/v6e).
            tb = pl.cdiv(pl.cdiv(batch, 2), 128) * 128
        else:
            tb = b128
    else:
        tb = tile_b_max
    b_pad = pl.cdiv(batch, tb) * tb
    return tb, b_pad


def centralised_critic_forward(x, w1, b1, w2, b2, *, tile_b_max=None,
                               use_bf16_inputs=False):
    """Fused forward pass. x: [B, 2*state_dim] float32 -> [B, 1] float32."""
    B, d_in = x.shape
    hidden = w1.shape[1]

    if tile_b_max is None:
        tile_b_max = _default_tile_b_max()
    tile_b_max = max(128, (int(tile_b_max) // 128) * 128)

    # Cap the tile by a VMEM budget (lane-padded x double-buffer + h temps +
    # lane-dense out buffers), so large tiles also fit v5e / v7x.
    d_lane = max(128, pl.cdiv(d_in, 128) * 128)
    bytes_per_row = d_lane * 4 * 2 + hidden * 4 * 2 + 64
    budget = 40 * 1024 * 1024
    cap = max(128, (budget // bytes_per_row) // 128 * 128)
    tile_b_max = min(tile_b_max, cap)

    tb, b_pad = _choose_tile(B, tile_b_max)
    num_tiles = b_pad // tb

    x_in = jnp.pad(x, ((0, b_pad - B), (0, 0))) if b_pad != B else x

    w1_k = w1
    if use_bf16_inputs:
        # Optional: halves the dominant HBM read stream. Not bit-exact with
        # the f32 PyTorch module, so off by default.
        x_in = x_in.astype(jnp.bfloat16)
        w1_k = w1.astype(jnp.bfloat16)

    # Biases / second-layer weights shaped for clean VMEM / SMEM residency.
    b1_2d = b1.reshape(1, hidden).astype(jnp.float32)   # broadcast over rows
    w2_row = w2.reshape(1, hidden).astype(jnp.float32)  # layer 2 as a lane row
    b2_2d = b2.reshape(1, 1).astype(jnp.float32)        # scalar, lives in SMEM

    vmem_limit = int(min(48 * 1024 * 1024,
                         max(32 * 1024 * 1024,
                             tb * bytes_per_row + 2 * 1024 * 1024)))

    itemsize_x = 2 if use_bf16_inputs else 4
    cost = pl.CostEstimate(
        flops=2 * b_pad * d_in * hidden + 2 * b_pad * hidden,
        transcendentals=0,
        bytes_accessed=(b_pad * d_in * itemsize_x
                        + d_in * hidden * itemsize_x
                        + 4 * (2 * hidden + 1)
                        + 4 * b_pad),
    )

    out = pl.pallas_call(
        _critic_kernel,
        out_shape=jax.ShapeDtypeStruct((num_tiles, tb), jnp.float32),
        grid=(num_tiles,),
        in_specs=[
            pl.BlockSpec((tb, d_in), lambda i: (i, 0)),         # x: tiled over batch
            pl.BlockSpec((d_in, hidden), lambda i: (0, 0)),     # w1: resident in VMEM
            pl.BlockSpec((1, hidden), lambda i: (0, 0)),        # b1: resident
            pl.BlockSpec((1, hidden), lambda i: (0, 0)),        # w2 row: resident
            pl.BlockSpec(memory_space=pltpu.MemorySpace.SMEM),  # b2 scalar in SMEM
        ],
        out_specs=pl.BlockSpec((1, tb), lambda i: (i, 0)),      # lane-dense row slab
        compiler_params=pltpu.CompilerParams(
            dimension_semantics=("parallel",),
            vmem_limit_bytes=vmem_limit,
        ),
        cost_estimate=cost,
    )(x_in, w1_k, b1_2d, w2_row, b2_2d)

    # (num_tiles, tb) slab -> flat batch order -> [B, 1]
    return out.reshape(-1)[:B].reshape(B, 1)


def init_params(key, state_dim, hidden=128):
    """Deterministic init matching PyTorch nn.Linear default (uniform +-1/sqrt(fan_in))."""
    d_in = state_dim * 2
    k1, k2, k3, k4 = jax.random.split(key, 4)
    bound1 = 1.0 / jnp.sqrt(d_in)
    bound2 = 1.0 / jnp.sqrt(hidden)
    # Stored as [in, out] (transpose of PyTorch's [out, in]).
    w1 = jax.random.uniform(k1, (d_in, hidden), jnp.float32, -bound1, bound1)
    b1 = jax.random.uniform(k2, (hidden,), jnp.float32, -bound1, bound1)
    w2 = jax.random.uniform(k3, (hidden, 1), jnp.float32, -bound2, bound2)
    b2 = jax.random.uniform(k4, (1,), jnp.float32, -bound2, bound2)
    return w1, b1, w2, b2


if __name__ == "__main__":
    key = jax.random.PRNGKey(0)
    state_dim = 8
    k_params, k_x1, k_x2 = jax.random.split(key, 3)
    w1, b1, w2, b2 = init_params(k_params, state_dim)

    def reference(x):
        return jnp.maximum(x @ w1 + b1, 0.0) @ w2 + b2

    # Small batch (not a multiple of 8/128): exercises padding, grid=(1,).
    x_small = jax.random.normal(k_x1, (6, state_dim * 2), jnp.float32)
    out_small = jax.block_until_ready(
        centralised_critic_forward(x_small, w1, b1, w2, b2))
    assert out_small.shape == (6, 1)
    assert jnp.allclose(out_small, reference(x_small), atol=1e-5, rtol=1e-5)

    # Larger batch: exercises the multi-tile lane-dense output path (grid >= 2).
    x_big = jax.random.normal(k_x2, (2500, state_dim * 2), jnp.float32)
    out_big = jax.block_until_ready(
        centralised_critic_forward(x_big, w1, b1, w2, b2))
    assert out_big.shape == (2500, 1)
    assert jnp.allclose(out_big, reference(x_big), atol=1e-4, rtol=1e-4)

    print("KERNEL_OK")
</pallas_src>

<mosaic_0001>
module attributes {stable_mosaic.version = 11 : i64} {
  func.func @_critic_kernel(%arg0: i32, %arg1: memref<128x16xf32, #tpu.memory_space<vmem>>, %arg2: memref<16x128xf32, #tpu.memory_space<vmem>>, %arg3: memref<1x128xf32, #tpu.memory_space<vmem>>, %arg4: memref<1x128xf32, #tpu.memory_space<vmem>>, %arg5: memref<1x1xf32, #tpu.memory_space<smem>>, %arg6: memref<1x128xf32, #tpu.memory_space<vmem>>) attributes {dimension_semantics = [#tpu.dimension_semantics<parallel>], iteration_bounds = array<i64: 1>, scalar_prefetch = 0 : i64, scratch_operands = 0 : i64, tpu.core_type = #tpu.core_type<tc>, window_params = [{transform_indices = @transform_0, window_bounds = array<i64: 128, 16>}, {pipeline_mode = #tpu.pipeline_mode<synchronous>, transform_indices = @transform_1, window_bounds = array<i64: 16, 128>}, {pipeline_mode = #tpu.pipeline_mode<synchronous>, transform_indices = @transform_2, window_bounds = array<i64: 1, 128>}, {pipeline_mode = #tpu.pipeline_mode<synchronous>, transform_indices = @transform_3, window_bounds = array<i64: 1, 128>}, {transform_indices = @transform_4, window_bounds = array<i64: 1, 1>}, {transform_indices = @transform_5, window_bounds = array<i64: 1, 128>}]} {
    %c0 = arith.constant 0 : index
    %c0_0 = arith.constant 0 : index
    %0 = vector.load %arg1[%c0, %c0_0] : memref<128x16xf32, #tpu.memory_space<vmem>>, vector<128x16xf32>
    %c0_1 = arith.constant 0 : index
    %c0_2 = arith.constant 0 : index
    %1 = vector.load %arg2[%c0_1, %c0_2] : memref<16x128xf32, #tpu.memory_space<vmem>>, vector<16x128xf32>
    %cst = arith.constant dense<0.000000e+00> : vector<128x128xf32>
    %2 = tpu.matmul %0, %1, %cst {dimension_numbers = #tpu.dot_dimension_numbers<[1], [0], [0], [1], [0, 0, 1, 1], [], []>} : vector<128x16xf32>, vector<16x128xf32>, vector<128x128xf32> -> vector<128x128xf32>
    %c0_3 = arith.constant 0 : index
    %c0_4 = arith.constant 0 : index
    %3 = vector.load %arg3[%c0_3, %c0_4] : memref<1x128xf32, #tpu.memory_space<vmem>>, vector<1x128xf32>
    %4 = vector.broadcast %3 : vector<1x128xf32> to vector<128x128xf32>
    %5 = arith.addf %2, %4 : vector<128x128xf32>
    %cst_5 = arith.constant 0.000000e+00 : f32
    %6 = vector.broadcast %cst_5 : f32 to vector<128x128xf32>
    %7 = arith.maximumf %5, %6 : vector<128x128xf32>
    %c0_6 = arith.constant 0 : index
    %c0_7 = arith.constant 0 : index
    %8 = vector.load %arg4[%c0_6, %c0_7] : memref<1x128xf32, #tpu.memory_space<vmem>>, vector<1x128xf32>
    %9 = vector.broadcast %8 : vector<1x128xf32> to vector<128x128xf32>
    %10 = arith.mulf %7, %9 : vector<128x128xf32>
    %cst_8 = arith.constant dense<0.000000e+00> : vector<128xf32>
    %11 = vector.multi_reduction <add>, %10, %cst_8 [1] : vector<128x128xf32> to vector<128xf32>
    %c0_9 = arith.constant 0 : index
    %c0_10 = arith.constant 0 : index
    %12 = memref.load %arg5[%c0_9, %c0_10] : memref<1x1xf32, #tpu.memory_space<smem>>
    %13 = vector.broadcast %12 : f32 to vector<128xf32>
    %14 = arith.addf %11, %13 : vector<128xf32>
    %15 = vector.shape_cast %14 : vector<128xf32> to vector<1x128xf32>
    %c0_11 = arith.constant 0 : index
    %c0_12 = arith.constant 0 : index
    %16 = vector.load %arg6[%c0_11, %c0_12] : memref<1x128xf32, #tpu.memory_space<vmem>>, vector<1x128xf32>
    tpu.vector_store %arg6[%c0_11, %c0_12], %15 {strides = array<i32>} : memref<1x128xf32, #tpu.memory_space<vmem>>, vector<1x128xf32>,
    return
  }
  func.func @transform_0(%arg0: i32) -> (i32, i32) {
    %c0_i32 = arith.constant 0 : i32
    %c0_i32_0 = arith.constant 0 : i32
    return %arg0, %c0_i32 : i32, i32
  }
  func.func @transform_1(%arg0: i32) -> (i32, i32) {
    %c0_i32 = arith.constant 0 : i32
    %c0_i32_0 = arith.constant 0 : i32
    %c0_i32_1 = arith.constant 0 : i32
    return %c0_i32, %c0_i32_0 : i32, i32
  }
  func.func @transform_2(%arg0: i32) -> (i32, i32) {
    %c0_i32 = arith.constant 0 : i32
    %c0_i32_0 = arith.constant 0 : i32
    %c0_i32_1 = arith.constant 0 : i32
    return %c0_i32, %c0_i32_0 : i32, i32
  }
  func.func @transform_3(%arg0: i32) -> (i32, i32) {
    %c0_i32 = arith.constant 0 : i32
    %c0_i32_0 = arith.constant 0 : i32
    %c0_i32_1 = arith.constant 0 : i32
    return %c0_i32, %c0_i32_0 : i32, i32
  }
  func.func @transform_4(%arg0: i32) -> (i32, i32) {
    %c0_i32 = arith.constant 0 : i32
    %c0_i32_0 = arith.constant 0 : i32
    %c0_i32_1 = arith.constant 0 : i32
    return %c0_i32, %c0_i32_0 : i32, i32
  }
  func.func @transform_5(%arg0: i32) -> (i32, i32) {
    %c0_i32 = arith.constant 0 : i32
    %c0_i32_0 = arith.constant 0 : i32
    return %arg0, %c0_i32 : i32, i32
  }
}

</mosaic_0001>

<bundles_post_ra>
// kernel: tpu_custom_call.1
= control target key start
LH: loop header
LB: loop body
LE: loop exit
PB: predicated region body
PF: predicated region fallthrough
CT: control target
= control target key end

     0   :  { %vm47_vm0 = vcmask 130048   ;;  %s789_s0 = inlined_call_operand.vmem [shape: f32[128,16], index: 0, kind: input, shape index: {}]   ;;  %s790_s1 = inlined_call_operand.vmem [shape: f32[16,128], index: 1, kind: input, shape index: {}]   ;;  %s791_s2 = inlined_call_operand.vmem [shape: f32[1,128], index: 2, kind: input, shape index: {}]   ;;  %s792_s3 = inlined_call_operand.vmem [shape: f32[1,128], index: 3, kind: input, shape index: {}]   ;;  %s793_s4 = inlined_call_operand.<no memory space> [shape: f32[1,1], index: 4, kind: input, shape index: {}]   ;;  %s794_s5 = inlined_call_operand.hbm [shape: f32[1,128], index: 5, kind: output, shape index: {}]  }
   0x1   :  { %v39_v0 = vld [vmem:[%s790_s1 + $0x8] sm:$0xff]  ;;  %v38_v1 = vld [vmem:[%s790_s1] sm:$0xff]  ;;  %v24_v6 = vld [vmem:[%s789_s0 + $0x10] sm:$0xff] }
   0x2   :  { %509 = vmatprep.subr.mxu0 %v39_v0  ;;  %537 = vmatprep.subr.mxu1 %v39_v0  ;;  %v22_v2 = vld [vmem:[%s789_s0] sm:$0xff]  ;;  %v23_v4 = vld [vmem:[%s789_s0 + $0x8] sm:$0xff]  ;;  %v32_v7 = vld [vmem:[%s789_s0 + $0x50] sm:$0xff] }
   0x3   :  { %510 = vmatpush3.msra.mxu0 %v39_v0  ;;  %539 = vmatpush3.msra.mxu1 %v39_v0  ;;  %v30_v3 = vld [vmem:[%s789_s0 + $0x40] sm:$0xff]  ;;  %v31_v5 = vld [vmem:[%s789_s0 + $0x48] sm:$0xff] }
   0x4   :  { %511 = vmatprep.subr.mxu0 %v38_v1  ;;  %538 = vmatprep.subr.mxu1 %v38_v1 }
   0x5   :  { %512 = vmatpush3.msra.mxu0 %v38_v1  ;;  %540 = vmatpush3.msra.mxu1 %v38_v1 }
   0x6   :  { %513 = vmatprep.mubr.msk.f32.mxu0 %vm47_vm0, %v22_v2  ;;  %525 = vmatprep.mubr.msk.f32.mxu1 %vm47_vm0, %v30_v3 }
   0x7   :  { %514 = vmatmul.mubr.msk.f32.vlgmr.msra.gmra.mxu0 %vm47_vm0, %v23_v4  ;;  %526 = vmatmul.mubr.msk.f32.vlgmr.msra.gmra.mxu1 %vm47_vm0, %v31_v5 }
   0x8   :  { %11 = vsyncpa [#allocation4], 0  ;;  %516 = vmatprep.mubr.msk.f32.mxu0 %vm47_vm0, %v24_v6  ;;  %v25_v8 = vld [vmem:[%s789_s0 + $0x18] sm:$0xff]  ;;  %528 = vmatprep.mubr.msk.f32.mxu1 %vm47_vm0, %v32_v7  ;;  %v26_v10 = vld [vmem:[%s789_s0 + $0x20] sm:$0xff]  ;;  %vm357_vm1 = vcmask 130112   ;;  %vm364_vm2 = vcmask 195712  }
   0x9   :  { %v33_v9 = vld [vmem:[%s789_s0 + $0x58] sm:$0xff]  ;;  %v34_v11 = vld [vmem:[%s789_s0 + $0x60] sm:$0xff]  ;;  %v27_v12 = vld [vmem:[%s789_s0 + $0x28] sm:$0xff]  ;;  %vm371_vm3 = vcmask 261312   ;;  %vm378_vm4 = vcmask 326912   ;;  %vm385_vm5 = vcmask 392512  }
   0xa   :  { %v35_v13 = vld [vmem:[%s789_s0 + $0x68] sm:$0xff]  ;;  %v28_v14 = vld [vmem:[%s789_s0 + $0x30] sm:$0xff]  ;;  %v29_v16 = vld [vmem:[%s789_s0 + $0x38] sm:$0xff]  ;;  %vm392_vm6 = vcmask 458112   ;;  %vm399_vm7 = vcmask 523712   ;;  %vm406_vm8 = vcmask 589312  }
   0xb   :  { %517 = vmatmul.mubr.msk.f32.gmra.mxu0 %vm47_vm0, %v25_v8  ;;  %529 = vmatmul.mubr.msk.f32.gmra.mxu1 %vm47_vm0, %v33_v9  ;;  %v36_v15 = vld [vmem:[%s789_s0 + $0x70] sm:$0xff]  ;;  %v37_v17 = vld [vmem:[%s789_s0 + $0x78] sm:$0xff]  ;;  %v668_v18 = vld [vmem:[%s791_s2] ss:$0 sm:$0xff]  ;;  %vm413_vm9 = vcmask 654912   ;;  %vm420_vm10 = vcmask 720512  }
   0xc   :  { %519 = vmatprep.mubr.msk.f32.mxu0 %vm47_vm0, %v26_v10  ;;  %531 = vmatprep.mubr.msk.f32.mxu1 %vm47_vm0, %v34_v11  ;;  %v675_v25 = vld [vmem:[%s792_s3] ss:$0 sm:$0xff]  ;;  %vm427_vm11 = vcmask 786112   ;;  %vm434_vm12 = vcmask 851712   ;;  %vm441_vm13 = vcmask 917312   ;;  %vm448_vm14 = vcmask 982912  }
   0xd   :  { %s564_s3 = smov [#allocation3]   ;;  %vm455_vm15 = vcmask 1048512  }
   0xf   :  { %520 = vmatmul.mubr.msk.f32.gmra.mxu0 %vm47_vm0, %v27_v12  ;;  %532 = vmatmul.mubr.msk.f32.gmra.mxu1 %vm47_vm0, %v35_v13 }
  0x10   :  { %522 = vmatprep.mubr.msk.f32.mxu0 %vm47_vm0, %v28_v14  ;;  %534 = vmatprep.mubr.msk.f32.mxu1 %vm47_vm0, %v36_v15 }
  0x13   :  { %523 = vmatmul.mubr.msk.f32.gmra.mxu0 %vm47_vm0, %v29_v16  ;;  %535 = vmatmul.mubr.msk.f32.gmra.mxu1 %vm47_vm0, %v37_v17 }
  0xc7   :  { %v515_v19 = vpop.f32.mrf.mxu0  ;;  %v527_v20 = vpop.f32.mrf.mxu1 }
  0xc8   :  { %v168_v21 = vadd.f32 %v515_v19, %v668_v18  ;;  %v208_v22 = vadd.f32 %v527_v20, %v668_v18 }
  0xc9   :  { %v162_v23 = vpop.f32.mrf.mxu0  ;;  %v202_v24 = vpop.f32.mrf.mxu1 }
  0xca   :  { %v242_v26 = vmax.f32 %v168_v21, 0.0  ;;  %v250_v27 = vmax.f32 %v208_v22, 0.0  ;;  %v163_v28 = vadd.f32 %v668_v18, %v162_v23  ;;  %v203_v34 = vadd.f32 %v668_v18, %v202_v24 }
  0xcb   :  { %v518_v29 = vpop.f32.mrf.mxu0  ;;  %v530_v30 = vpop.f32.mrf.mxu1  ;;  %v346_v21 = vlaneseq }
  0xcc   :  { %v178_v31 = vadd.f32 %v518_v29, %v668_v18  ;;  %v273_v32 = vmul.f32 %v675_v25, %v250_v27  ;;  %v241_v33 = vmax.f32 %v163_v28, 0.0  ;;  %v218_v36 = vadd.f32 %v530_v30, %v668_v18 }
  0xcd   :  { %v172_v35 = vpop.f32.mrf.mxu0  ;;  %v265_v37 = vmul.f32 %v675_v25, %v242_v26  ;;  %v212_v39 = vpop.f32.mrf.mxu1  ;;  %v249_v44 = vmax.f32 %v203_v34, 0.0  ;;  %v709_v23 = vand.u32 127, %v346_v21  ;;  %v711_v27 = vshrl.u32 %v346_v21, 7 }
  0xce   :  { %v244_v38 = vmax.f32 %v178_v31, 0.0  ;;  %298 = vadd.xlane.f32.xlu1 %v273_v32  ;;  %v252_v40 = vmax.f32 %v218_v36, 0.0  ;;  %v173_v42 = vadd.f32 %v668_v18, %v172_v35  ;;  %v213_v45 = vadd.f32 %v668_v18, %v212_v39 }
  0xcf   :  { %282 = vadd.xlane.f32.xlu0 %v265_v37  ;;  %v521_v41 = vpop.f32.mrf.mxu0  ;;  %v264_v46 = vmul.f32 %v675_v25, %v241_v33  ;;  %v533_v49 = vpop.f32.mrf.mxu1  ;;  %v272_v55 = vmul.f32 %v675_v25, %v249_v44  ;;  %v352_v28 = vadd.s32 4294967288, %v709_v23  ;;  %v359_v29 = vadd.s32 4294967280, %v709_v23 }
  0xd0   :  { %v267_v43 = vmul.f32 %v675_v25, %v244_v38  ;;  %v275_v48 = vmul.f32 %v675_v25, %v252_v40  ;;  %v243_v51 = vmax.f32 %v173_v42, 0.0  ;;  %v188_v52 = vadd.f32 %v521_v41, %v668_v18 }
  0xd1   :  { %v182_v47 = vpop.f32.mrf.mxu0  ;;  %v251_v53 = vmax.f32 %v213_v45, 0.0  ;;  %v222_v57 = vpop.f32.mrf.mxu1  ;;  %v228_v2 = vadd.f32 %v533_v49, %v668_v18  ;;  %v350_v31 = vsub.s32 %v709_v23, %v711_v27  ;;  %v366_v34 = vadd.s32 4294967272, %v709_v23 }
  0xd2   :  { %286 = vadd.xlane.f32.xlu1 %v267_v43  ;;  %v183_v54 = vadd.f32 %v668_v18, %v182_v47  ;;  %v246_v58 = vmax.f32 %v188_v52, 0.0  ;;  %v266_v60 = vmul.f32 %v675_v25, %v243_v51  ;;  %v223_v5 = vadd.f32 %v668_v18, %v222_v57 }
  0xd3   :  { %280 = vadd.xlane.f32.xlu0 %v264_v46  ;;  %v524_v50 = vpop.f32.mrf.mxu0  ;;  %v274_v63 = vmul.f32 %v675_v25, %v251_v53  ;;  %v536_v0 = vpop.f32.mrf.mxu1  ;;  %v254_v8 = vmax.f32 %v228_v2, 0.0  ;;  %v355_v35 = vsub.s32 %v352_v28, %v711_v27  ;;  %v362_v37 = vsub.s32 %v359_v29, %v711_v27 }
  0xd4   :  { %v198_v59 = vadd.f32 %v524_v50, %v668_v18  ;;  %v245_v61 = vmax.f32 %v183_v54, 0.0  ;;  %v269_v3 = vmul.f32 %v675_v25, %v246_v58  ;;  %v238_v9 = vadd.f32 %v536_v0, %v668_v18 }
  0xd5   :  { %v192_v56 = vpop.f32.mrf.mxu0  ;;  %v232_v7 = vpop.f32.mrf.mxu1  ;;  %v253_v11 = vmax.f32 %v223_v5, 0.0  ;;  %v277_v15 = vmul.f32 %v675_v25, %v254_v8  ;;  %v730_v38 = vadd.s32 4294967224, %v709_v23  ;;  %v733_v39 = vadd.s32 4294967232, %v709_v23 }
  0xd6   :  { %302 = vadd.xlane.f32.xlu1 %v275_v48  ;;  %v193_v62 = vadd.f32 %v668_v18, %v192_v56  ;;  %v248_v1 = vmax.f32 %v198_v59, 0.0  ;;  %v268_v6 = vmul.f32 %v675_v25, %v245_v61  ;;  %v233_v12 = vadd.f32 %v668_v18, %v232_v7 }
  0xd7   :  { %296 = vadd.xlane.f32.xlu0 %v272_v55  ;;  %v256_v14 = vmax.f32 %v238_v9, 0.0  ;;  %v276_v17 = vmul.f32 %v675_v25, %v253_v11  ;;  %v373_v41 = vadd.s32 4294967264, %v709_v23  ;;  %v737_v43 = vadd.s32 4294967208, %v709_v23 }
  0xd8   :  { %v247_v4 = vmax.f32 %v193_v62, 0.0  ;;  %v271_v10 = vmul.f32 %v675_v25, %v248_v1  ;;  %v255_v16 = vmax.f32 %v233_v12, 0.0  ;;  %v380_v46 = vadd.s32 4294967256, %v709_v23 }
  0xd9   :  { %v279_v19 = vmul.f32 %v675_v25, %v256_v14  ;;  %v369_v47 = vsub.s32 %v366_v34, %v711_v27  ;;  %v415_v48 = vadd.s32 4294967216, %v709_v23  ;;  %v394_v52 = vadd.s32 4294967240, %v709_v23 }
  0xda   :  { %284 = vadd.xlane.f32.xlu1 %v266_v60  ;;  %v270_v13 = vmul.f32 %v675_v25, %v247_v4  ;;  %v278_v20 = vmul.f32 %v675_v25, %v255_v16  ;;  %v718_v25 = vstv %s793_s4  ;;  %v411_v53 = vsub.s32 %v730_v38, %v711_v27  ;;  %s465_s4 = sshll.u32 %s564_s3, 4  ;;  %s466_s4 = int_to_ptr.vmem [resolvable:$true] %s465_s4 }
  0xdb   :  { %300 = vadd.xlane.f32.xlu0 %v274_v63  ;;  %v404_v54 = vsub.s32 %v733_v39, %v711_v27  ;;  %v376_v56 = vsub.s32 %v373_v41, %v711_v27  ;;  %v387_v57 = vadd.s32 4294967248, %v709_v23  ;;  %v425_v59 = vsub.s32 %v737_v43, %v711_v27  ;;  %s542_s6 = scalar_lea.vmem %s466_s4, 16  ;;  %s546_s7 = scalar_lea.vmem %s466_s4, 32 }
  0xdc   :  { %v383_v60 = vsub.s32 %v380_v46, %v711_v27  ;;  %v418_v0 = vsub.s32 %v415_v48, %v711_v27  ;;  %v436_v7 = vadd.s32 4294967192, %v709_v23  ;;  %v429_v12 = vadd.s32 4294967200, %v709_v23  ;;  %p543_p0 = scmp.ne.s32.totalorder %s466_s4, %s542_s6  ;;  %p547_p1 = scmp.lt.s32.totalorder %s466_s4, %s466_s4 }
  0xdd   :  { %p548_p2 = scmp.lt.s32.totalorder %s546_s7, %s542_s6 }
  0xde   :  { %290 = vadd.xlane.f32.xlu1 %v269_v3  ;;  %v397_v3 = vsub.s32 %v394_v52, %v711_v27 }
  0xdf   :  { %288 = vadd.xlane.f32.xlu0 %v268_v6  ;;  %v390_v6 = vsub.s32 %v387_v57, %v711_v27  ;;  %p549_p3 = por %p548_p2, %p547_p1 }
  0xe1   :  { %p550_p4 = pnand %p549_p3, %p543_p0 }
  0xe2   :  { %294 = vadd.xlane.f32.xlu1 %v271_v10 }
  0xe3   :  { %292 = vadd.xlane.f32.xlu0 %v270_v13 }
  0xe6   :  { %306 = vadd.xlane.f32.xlu1 %v277_v15 }
  0xe7   :  { %304 = vadd.xlane.f32.xlu0 %v276_v17 }
  0xea   :  { %310 = vadd.xlane.f32.xlu1 %v279_v19  ;;  %v450_v19 = vadd.s32 4294967176, %v709_v23 }
  0xeb   :  { %308 = vadd.xlane.f32.xlu0 %v278_v20 }
 0x157   :  { %v707_v18 = vpop.xlane.xlu1 %298 }
 0x158   :  { %v283_v22 = vpop.xlane.xlu0 %282  ;;  %v323_v16 = vadd.f32 %v718_v25, %v707_v18  ;;  %v432_v18 = vsub.s32 %v429_v12, %v711_v27 }
 0x159   :  { %v315_v36 = vadd.f32 %v718_v25, %v283_v22  ;;  %v439_v22 = vsub.s32 %v436_v7, %v711_v27 }
 0x15b   :  { %v287_v24 = vpop.xlane.xlu1 %286  ;;  %v356_v49 = vrot.slane %v315_v36, %v355_v35  ;;  %v412_v35 = vrot.slane %v323_v16, %v411_v53 }
 0x15c   :  { %v281_v26 = vpop.xlane.xlu0 %280  ;;  %v317_v50 = vadd.f32 %v718_v25, %v287_v24 }
 0x15d   :  { %v314_v32 = vadd.f32 %v718_v25, %v281_v26  ;;  %v443_v26 = vadd.s32 4294967184, %v709_v23 }
 0x15e   :  { %v370_v2 = vrot.slane %v317_v50, %v369_v47 }
 0x15f   :  { %v720_v30 = vpop.xlane.xlu1 %302  ;;  %v351_v42 = vrot.slane %v314_v32, %v350_v31 }
 0x160   :  { %v297_v33 = vpop.xlane.xlu0 %296  ;;  %v325_v28 = vadd.f32 %v718_v25, %v720_v30 }
 0x161   :  { %v358_v58 = vsel %vm357_vm1, %v356_v49, %v351_v42  ;;  %v322_v13 = vadd.f32 %v718_v25, %v297_v33 }
 0x162   :  { %v426_v41 = vrot.slane %v325_v28, %v425_v59 }
 0x163   :  { %v285_v40 = vpop.xlane.xlu1 %284  ;;  %v405_v32 = vrot.slane %v322_v13, %v404_v54 }
 0x164   :  { %v316_v44 = vadd.f32 %v718_v25, %v285_v40  ;;  %v301_v45 = vpop.xlane.xlu0 %300  ;;  %v446_v40 = vsub.s32 %v443_v26, %v711_v27 }
 0x165   :  { %v324_v20 = vadd.f32 %v718_v25, %v301_v45 }
 0x166   :  { %v363_v51 = vrot.slane %v316_v44, %v362_v37  ;;  %v453_v37 = vsub.s32 %v450_v19, %v711_v27 }
 0x167   :  { %v291_v55 = vpop.xlane.xlu1 %290  ;;  %v419_v30 = vrot.slane %v324_v20, %v418_v0 }
 0x168   :  { %v319_v61 = vadd.f32 %v718_v25, %v291_v55  ;;  %v289_v62 = vpop.xlane.xlu0 %288  ;;  %v365_v63 = vsel %vm364_vm2, %v363_v51, %v358_v58 }
 0x169   :  { %v318_v1 = vadd.f32 %v718_v25, %v289_v62  ;;  %v372_v9 = vsel %vm371_vm3, %v370_v2, %v365_v63 }
 0x16a   :  { %v384_v8 = vrot.slane %v319_v61, %v383_v60 }
 0x16b   :  { %v377_v4 = vrot.slane %v318_v1, %v376_v56  ;;  %v295_v5 = vpop.xlane.xlu1 %294 }
 0x16c   :  { %v321_v10 = vadd.f32 %v718_v25, %v295_v5  ;;  %v293_v11 = vpop.xlane.xlu0 %292 }
 0x16d   :  { %v379_v14 = vsel %vm378_vm4, %v377_v4, %v372_v9  ;;  %v320_v15 = vadd.f32 %v718_v25, %v293_v11 }
 0x16e   :  { %v398_v17 = vrot.slane %v321_v10, %v397_v3  ;;  %v386_v29 = vsel %vm385_vm5, %v384_v8, %v379_v14 }
 0x16f   :  { %v391_v21 = vrot.slane %v320_v15, %v390_v6  ;;  %v307_v24 = vpop.xlane.xlu1 %306 }
 0x170   :  { %v305_v31 = vpop.xlane.xlu0 %304  ;;  %v327_v23 = vadd.f32 %v718_v25, %v307_v24 }
 0x171   :  { %v393_v33 = vsel %vm392_vm6, %v391_v21, %v386_v29  ;;  %v326_v34 = vadd.f32 %v718_v25, %v305_v31 }
 0x172   :  { %v400_v36 = vsel %vm399_vm7, %v398_v17, %v393_v33  ;;  %v440_v48 = vrot.slane %v327_v23, %v439_v22 }
 0x173   :  { %v407_v38 = vsel %vm406_vm8, %v405_v32, %v400_v36  ;;  %v311_v39 = vpop.xlane.xlu1 %310  ;;  %v433_v46 = vrot.slane %v326_v34, %v432_v18 }
 0x174   :  { %v414_v42 = vsel %vm413_vm9, %v412_v35, %v407_v38  ;;  %v329_v43 = vadd.f32 %v718_v25, %v311_v39  ;;  %v309_v44 = vpop.xlane.xlu0 %308 }
 0x175   :  { %v421_v45 = vsel %vm420_vm10, %v419_v30, %v414_v42  ;;  %v328_v47 = vadd.f32 %v718_v25, %v309_v44 }
 0x176   :  { %v428_v49 = vsel %vm427_vm11, %v426_v41, %v421_v45  ;;  %v454_v50 = vrot.slane %v329_v43, %v453_v37 }
 0x177   :  { %v435_v27 = vsel %vm434_vm12, %v433_v46, %v428_v49  ;;  %v447_v51 = vrot.slane %v328_v47, %v446_v40 }
 0x178   :  { %v442_v52 = vsel %vm441_vm13, %v440_v48, %v435_v27 }
 0x179   :  { %v449_v53 = vsel %vm448_vm14, %v447_v51, %v442_v52 }
 0x17a   :  { %v456_v54 = vsel %vm455_vm15, %v454_v50, %v449_v53 }
 0x17b   :  { %458 = vst [vmem:[#allocation3] sm:$0x1] %v456_v54 }
 0x17c   :  { %553 = shalt.err (!%p550_p4)
}
 0x17d   :  { %468 = dma.vmem_to_hbm [thread:$0]  %s466_s4, 16, %s794_s5, [#allocation4]  }
 0x17e   :  { %562 = dma.done.wait [#allocation4], 16  }
 0x17f   :  { %563 = vsyncadd [#allocation4], 4294967280 }
 0x180   :  { %472 = vsyncpa [#allocation4], 1 }

</bundles_post_ra>
